<compile_context>
chip_gen: v6e
topology: v6e:2x2x1
jax: 0.10.0
libtpu: 0.0.40
codegen_flags: <defaults>
</compile_context>

<pallas_src>
import jax
import jax.numpy as jnp
from jax.experimental import pallas as pl
from jax.experimental.pallas import tpu as pltpu


# ----------------------------------------------------------------------------
# Kernel: (TILE_P, C1) x (C1, K*K*C2) matmul + fused folded-BN + SiLU
# ----------------------------------------------------------------------------
def _deconv_bn_silu_kernel(x_ref, w_ref, scale_ref, bias_ref, o_ref):
    # bf16 inputs, f32 accumulation on the MXU.
    acc = jnp.dot(x_ref[...], w_ref[...], preferred_element_type=jnp.float32)
    # Folded BatchNorm + SiLU epilogue in f32 (VPU/EUP).
    z = acc * scale_ref[...] + bias_ref[...]
    o_ref[...] = (z * jax.nn.sigmoid(z)).astype(o_ref.dtype)


def conv_transpose_bn_silu(x_nchw, w, bn_gamma, bn_beta, bn_mean, bn_var,
                           eps=1e-5, tile_p=512):
    """Forward of ultralytics ConvTranspose (k=2, s=2, p=0, bn=True, act=SiLU).

    x_nchw : (N, C1, H, W)  float32
    w      : (C1, C2, K, K) float32  -- torch ConvTranspose2d weight layout
    returns: (N, C2, K*H, K*W) float32
    """
    N, C1, H, W = x_nchw.shape
    C2, K = w.shape[1], w.shape[2]
    assert w.shape[0] == C1 and w.shape[3] == K
    C4 = K * K * C2

    # ---- fold inference-mode BatchNorm into per-channel scale/bias ----
    scale = bn_gamma / jnp.sqrt(bn_var + eps)          # (C2,)
    bias = bn_beta - bn_mean * scale                   # (C2,)
    # output column q = (kh*K + kw)*C2 + co  ->  replicate per sub-pixel
    scale4 = jnp.tile(scale, K * K).reshape(1, C4).astype(jnp.float32)
    bias4 = jnp.tile(bias, K * K).reshape(1, C4).astype(jnp.float32)

    # ---- activations / weights to bf16 for the MXU (f32 accumulate) ----
    x_nhwc = jnp.transpose(x_nchw, (0, 2, 3, 1))        # NCHW -> NHWC
    P = N * H * W
    x2d = x_nhwc.reshape(P, C1).astype(jnp.bfloat16)
    # (C1, C2, K, K) -> (C1, K, K, C2) -> (C1, K*K*C2)
    w2d = jnp.transpose(w, (0, 2, 3, 1)).reshape(C1, C4).astype(jnp.bfloat16)

    # ---- tile P (sublane-aligned, multiple of 8), pad if needed ----
    tile_p = max(8, (int(tile_p) // 8) * 8)
    tile_p = min(tile_p, ((P + 7) // 8) * 8)
    Pp = ((P + tile_p - 1) // tile_p) * tile_p
    if Pp != P:
        x2d = jnp.pad(x2d, ((0, Pp - P), (0, 0)))
    grid = (Pp // tile_p,)

    cost = pl.CostEstimate(
        flops=2 * P * C1 * C4 + 2 * P * C4,
        transcendentals=P * C4,
        bytes_accessed=(x2d.size * 2 + w2d.size * 2
                        + Pp * C4 * 4 + 2 * C4 * 4),
    )

    y2d = pl.pallas_call(
        _deconv_bn_silu_kernel,
        out_shape=jax.ShapeDtypeStruct((Pp, C4), jnp.float32),
        grid=grid,
        in_specs=[
            pl.BlockSpec((tile_p, C1), lambda i: (i, 0)),   # activation tile
            pl.BlockSpec((C1, C4), lambda i: (0, 0)),       # weights (resident)
            pl.BlockSpec((1, C4), lambda i: (0, 0)),        # folded BN scale
            pl.BlockSpec((1, C4), lambda i: (0, 0)),        # folded BN bias
        ],
        out_specs=pl.BlockSpec((tile_p, C4), lambda i: (i, 0)),
        compiler_params=pltpu.CompilerParams(
            dimension_semantics=("parallel",),              # megacore sharding on v7x
            vmem_limit_bytes=48 * 1024 * 1024,              # headroom below v7x 64 MiB
        ),
        cost_estimate=cost,
    )(x2d, w2d, scale4, bias4)

    y2d = y2d[:P]
    # (P, K*K*C2) -> (N, H, W, K, K, C2) -> interleave sub-pixels -> NCHW
    y = y2d.reshape(N, H, W, K, K, C2)
    y = jnp.transpose(y, (0, 1, 3, 2, 4, 5)).reshape(N, K * H, K * W, C2)
    return jnp.transpose(y, (0, 3, 1, 2))


# ----------------------------------------------------------------------------
# Pure-JAX reference: direct ConvTranspose2d definition (oh = s*i + kh, p = 0)
# ----------------------------------------------------------------------------
def conv_transpose_reference(x_nchw, w, bn_gamma, bn_beta, bn_mean, bn_var,
                             eps=1e-5):
    N, C1, H, W = x_nchw.shape
    C2, K = w.shape[1], w.shape[2]
    scale = bn_gamma / jnp.sqrt(bn_var + eps)
    bias = bn_beta - bn_mean * scale

    # match the kernel's bf16 input quantization (accumulation in f32)
    x_nhwc = jnp.transpose(x_nchw, (0, 2, 3, 1)).astype(jnp.bfloat16).astype(jnp.float32)
    wf = w.astype(jnp.bfloat16).astype(jnp.float32)

    out = jnp.zeros((N, K * H, K * W, C2), jnp.float32)
    for kh in range(K):
        for kw in range(K):
            contrib = jnp.einsum("nijc,co->nijo", x_nhwc, wf[:, :, kh, kw])
            out = out.at[:, kh::K, kw::K, :].add(contrib)

    z = out * scale + bias
    z = z * jax.nn.sigmoid(z)
    return jnp.transpose(z, (0, 3, 1, 2))


if __name__ == "__main__":
    key = jax.random.PRNGKey(0)
    kx, kw_, kg, kb, km, kv = jax.random.split(key, 6)

    # Small shapes: batch=2, c1=4, c2=8, spatial 16x16, k=s=2, p=0 (module defaults).
    N, C1, H, W = 2, 4, 16, 16
    C2, K = 8, 2

    x = jax.random.normal(kx, (N, C1, H, W), jnp.float32)
    # torch ConvTranspose2d weight layout: (in_ch, out_ch, kH, kW), bias=False (bn=True)
    w = 0.1 * jax.random.normal(kw_, (C1, C2, K, K), jnp.float32)
    gamma = 1.0 + 0.1 * jax.random.normal(kg, (C2,), jnp.float32)
    beta = 0.1 * jax.random.normal(kb, (C2,), jnp.float32)
    mean = 0.05 * jax.random.normal(km, (C2,), jnp.float32)
    var = jnp.abs(1.0 + 0.1 * jax.random.normal(kv, (C2,), jnp.float32))

    out = conv_transpose_bn_silu(x, w, gamma, beta, mean, var, tile_p=256)
    out = jax.block_until_ready(out)
    assert out.shape == (N, C2, K * H, K * W), out.shape

    ref = conv_transpose_reference(x, w, gamma, beta, mean, var)
    err = float(jnp.max(jnp.abs(out - ref)))
    assert jnp.allclose(out, ref, atol=1e-3, rtol=1e-3), f"mismatch vs reference: {err}"

    print("KERNEL_OK")
</pallas_src>

<mosaic_0001>
module attributes {stable_mosaic.version = 11 : i64} {
  func.func @_deconv_bn_silu_kernel(%arg0: i32, %arg1: memref<256x4xbf16, #tpu.memory_space<vmem>>, %arg2: memref<4x32xbf16, #tpu.memory_space<vmem>>, %arg3: memref<1x32xf32, #tpu.memory_space<vmem>>, %arg4: memref<1x32xf32, #tpu.memory_space<vmem>>, %arg5: memref<256x32xf32, #tpu.memory_space<vmem>>) attributes {dimension_semantics = [#tpu.dimension_semantics<parallel>], iteration_bounds = array<i64: 2>, scalar_prefetch = 0 : i64, scratch_operands = 0 : i64, tpu.core_type = #tpu.core_type<tc>, window_params = [{transform_indices = @transform_0, window_bounds = array<i64: 256, 4>}, {pipeline_mode = #tpu.pipeline_mode<synchronous>, transform_indices = @transform_1, window_bounds = array<i64: 4, 32>}, {pipeline_mode = #tpu.pipeline_mode<synchronous>, transform_indices = @transform_2, window_bounds = array<i64: 1, 32>}, {pipeline_mode = #tpu.pipeline_mode<synchronous>, transform_indices = @transform_3, window_bounds = array<i64: 1, 32>}, {transform_indices = @transform_4, window_bounds = array<i64: 256, 32>}]} {
    %c0 = arith.constant 0 : index
    %c0_0 = arith.constant 0 : index
    %0 = vector.load %arg1[%c0, %c0_0] : memref<256x4xbf16, #tpu.memory_space<vmem>>, vector<256x4xbf16>
    %c0_1 = arith.constant 0 : index
    %c0_2 = arith.constant 0 : index
    %1 = vector.load %arg2[%c0_1, %c0_2] : memref<4x32xbf16, #tpu.memory_space<vmem>>, vector<4x32xbf16>
    %cst = arith.constant dense<0.000000e+00> : vector<256x32xf32>
    %2 = tpu.matmul %0, %1, %cst {dimension_numbers = #tpu.dot_dimension_numbers<[1], [0], [0], [1], [0, 0, 1, 1], [], []>} : vector<256x4xbf16>, vector<4x32xbf16>, vector<256x32xf32> -> vector<256x32xf32>
    %c0_3 = arith.constant 0 : index
    %c0_4 = arith.constant 0 : index
    %3 = vector.load %arg3[%c0_3, %c0_4] : memref<1x32xf32, #tpu.memory_space<vmem>>, vector<1x32xf32>
    %4 = vector.broadcast %3 : vector<1x32xf32> to vector<256x32xf32>
    %5 = arith.mulf %2, %4 : vector<256x32xf32>
    %c0_5 = arith.constant 0 : index
    %c0_6 = arith.constant 0 : index
    %6 = vector.load %arg4[%c0_5, %c0_6] : memref<1x32xf32, #tpu.memory_space<vmem>>, vector<1x32xf32>
    %7 = vector.broadcast %6 : vector<1x32xf32> to vector<256x32xf32>
    %8 = arith.addf %5, %7 : vector<256x32xf32>
    %9 = arith.negf %8 : vector<256x32xf32>
    %10 = math.exp %9 : vector<256x32xf32>
    %cst_7 = arith.constant 1.000000e+00 : f32
    %11 = vector.broadcast %cst_7 : f32 to vector<256x32xf32>
    %12 = arith.addf %11, %10 : vector<256x32xf32>
    %13 = arith.divf %11, %12 : vector<256x32xf32>
    %14 = arith.mulf %8, %13 : vector<256x32xf32>
    %c0_8 = arith.constant 0 : index
    %c0_9 = arith.constant 0 : index
    %15 = vector.load %arg5[%c0_8, %c0_9] : memref<256x32xf32, #tpu.memory_space<vmem>>, vector<256x32xf32>
    tpu.vector_store %arg5[%c0_8, %c0_9], %14 {strides = array<i32>} : memref<256x32xf32, #tpu.memory_space<vmem>>, vector<256x32xf32>,
    return
  }
  func.func @transform_0(%arg0: i32) -> (i32, i32) {
    %c0_i32 = arith.constant 0 : i32
    %c0_i32_0 = arith.constant 0 : i32
    return %arg0, %c0_i32 : i32, i32
  }
  func.func @transform_1(%arg0: i32) -> (i32, i32) {
    %c0_i32 = arith.constant 0 : i32
    %c0_i32_0 = arith.constant 0 : i32
    %c0_i32_1 = arith.constant 0 : i32
    return %c0_i32, %c0_i32_0 : i32, i32
  }
  func.func @transform_2(%arg0: i32) -> (i32, i32) {
    %c0_i32 = arith.constant 0 : i32
    %c0_i32_0 = arith.constant 0 : i32
    %c0_i32_1 = arith.constant 0 : i32
    return %c0_i32, %c0_i32_0 : i32, i32
  }
  func.func @transform_3(%arg0: i32) -> (i32, i32) {
    %c0_i32 = arith.constant 0 : i32
    %c0_i32_0 = arith.constant 0 : i32
    %c0_i32_1 = arith.constant 0 : i32
    return %c0_i32, %c0_i32_0 : i32, i32
  }
  func.func @transform_4(%arg0: i32) -> (i32, i32) {
    %c0_i32 = arith.constant 0 : i32
    %c0_i32_0 = arith.constant 0 : i32
    return %arg0, %c0_i32 : i32, i32
  }
}

</mosaic_0001>

<bundles_post_ra>
// kernel: tpu_custom_call.1
= control target key start
LH: loop header
LB: loop body
LE: loop exit
PB: predicated region body
PF: predicated region fallthrough
CT: control target
= control target key end

     0   :  { %s1237_s15 = smov 0   ;;  %s1563_s0 = inlined_call_operand.vmem [shape: bf16[512,4], index: 0, kind: input, shape index: {}]   ;;  %s1564_s1 = inlined_call_operand.vmem [shape: bf16[4,32], index: 1, kind: input, shape index: {}]   ;;  %s1565_s2 = inlined_call_operand.vmem [shape: f32[1,32], index: 2, kind: input, shape index: {}]   ;;  %s1566_s3 = inlined_call_operand.vmem [shape: f32[1,32], index: 3, kind: input, shape index: {}]   ;;  %s1567_s4 = inlined_call_operand.vmem [shape: f32[512,32], index: 4, kind: output, shape index: {}]  }
   0x1 LB: > { %s920_s16 = sadd.s32 4294967295, %s1210_s15   ;;  %p924_p0 = scmp.ge.s32.totalorder %s1210_s15, 1  ;;  %s1210_s15 = sphi %s1237_s15, %s14_s15  }
   0x2   : > { %p163_p1 = scmp.lt.s32.totalorder %s1210_s15, 3 }
   0x4   : > { %p164_p2 = pnand %p924_p0, %p163_p1 }
   0x5   : > { %s925_s19 = sshll.u32 (!%p164_p2), %s920_s16, 5 }
   0x6   : > { %167 = sbr.rel (%p164_p2) target bundleno = 295 (0x127), region = 36  ;;  %p190_p3 = scmp.lt.s32.totalorder (!%p164_p2), %s925_s19, 63 }
   0xb   : > { %v234_v0 = vld [vmem:[%s1564_s1] sm:$0x3]  ;;  %vm364_vm0 = vcmask 1041408   ;;  %s1569_s19 = smov (!%p190_p3, %s925_s19), 63  ;;  %vm315_vm1 = vcmask 31744   ;;  %vm831_vm2 = vcmask 261120  }
   0xc   : > { %1050 = vmatprep.subr.msk.bf16.mxu0 %vm364_vm0, %v234_v0  ;;  %1051 = vmatprep.subr.msk.bf16.mxu1 %vm364_vm0, %v234_v0  ;;  %v366_v1 = vsel %vm364_vm0, %v234_v0, 0  ;;  %s926_s20 = sshll.u32 %s1569_s19, 2  ;;  %v1291_v18 = vld [vmem:[%s1565_s2] ss:$0 sm:$0xff]  ;;  %s928_s28 = sshll.u32 %s1569_s19, 3 }
   0xd   : > { %1015 = vmatpush3.bf16.msra.mxu0 %v366_v1  ;;  %1049 = vmatpush3.bf16.msra.mxu1 %v366_v1  ;;  %s1254_s23 = scalar_lea.vmem %s1563_s0, %s926_s20  ;;  %v1296_v20 = vld [vmem:[%s1566_s3] ss:$0 sm:$0xff]  ;;  %s1420_s5 = scalar_lea.vmem %s1567_s4, %s928_s28 }
   0xe   : > { %v1060_v2 = vld [vmem:[%s1254_s23] sm:$0xff]   ;;  %v1062_v4 = vld [vmem:[%s1254_s23 + $0x8] sm:$0xff]   ;;  %v1064_v6 = vld [vmem:[%s1254_s23 + $0x10] sm:$0xff]  }
   0xf   : > { %v1061_v3 = vld [vmem:[%s1254_s23 + $0x40] sm:$0xff]   ;;  %1016 = vmatprep.mubr.msk.bf16.mxu0 %vm315_vm1, %v1060_v2  ;;  %v1063_v5 = vld [vmem:[%s1254_s23 + $0x48] sm:$0xff]   ;;  %v1065_v7 = vld [vmem:[%s1254_s23 + $0x50] sm:$0xff]  }
  0x10   : > { %1032 = vmatprep.mubr.msk.bf16.mxu1 %vm315_vm1, %v1061_v3  ;;  %1017 = vmatmul.mubr.msk.bf16.vlgmr.msra.gmra.mxu0 %vm315_vm1, %v1062_v4  ;;  %v1066_v8 = vld [vmem:[%s1254_s23 + $0x18] sm:$0xff]   ;;  %v1068_v10 = vld [vmem:[%s1254_s23 + $0x20] sm:$0xff]   ;;  %v1070_v12 = vld [vmem:[%s1254_s23 + $0x28] sm:$0xff]  }
  0x11   : > { %1033 = vmatmul.mubr.msk.bf16.vlgmr.msra.gmra.mxu1 %vm315_vm1, %v1063_v5  ;;  %1020 = vmatprep.mubr.msk.bf16.mxu0 %vm315_vm1, %v1064_v6  ;;  %v1067_v9 = vld [vmem:[%s1254_s23 + $0x58] sm:$0xff]   ;;  %v1069_v11 = vld [vmem:[%s1254_s23 + $0x60] sm:$0xff]   ;;  %v1071_v13 = vld [vmem:[%s1254_s23 + $0x68] sm:$0xff]  }
  0x12   : > { %1036 = vmatprep.mubr.msk.bf16.mxu1 %vm315_vm1, %v1065_v7  ;;  %v1072_v14 = vld [vmem:[%s1254_s23 + $0x30] sm:$0xff]   ;;  %v1074_v16 = vld [vmem:[%s1254_s23 + $0x38] sm:$0xff]  }
  0x13   : > { %v1073_v15 = vld [vmem:[%s1254_s23 + $0x70] sm:$0xff]   ;;  %v1075_v17 = vld [vmem:[%s1254_s23 + $0x78] sm:$0xff]  }
  0x18   : > { %1021 = vmatmul.mubr.msk.bf16.gmra.mxu0 %vm315_vm1, %v1066_v8 }
  0x19   : > { %1037 = vmatmul.mubr.msk.bf16.gmra.mxu1 %vm315_vm1, %v1067_v9  ;;  %1024 = vmatprep.mubr.msk.bf16.mxu0 %vm315_vm1, %v1068_v10 }
  0x1a   : > { %1040 = vmatprep.mubr.msk.bf16.mxu1 %vm315_vm1, %v1069_v11 }
  0x20   : > { %1025 = vmatmul.mubr.msk.bf16.gmra.mxu0 %vm315_vm1, %v1070_v12 }
  0x21   : > { %1041 = vmatmul.mubr.msk.bf16.gmra.mxu1 %vm315_vm1, %v1071_v13  ;;  %1028 = vmatprep.mubr.msk.bf16.mxu0 %vm315_vm1, %v1072_v14 }
  0x22   : > { %1044 = vmatprep.mubr.msk.bf16.mxu1 %vm315_vm1, %v1073_v15 }
  0x28   : > { %1029 = vmatmul.mubr.msk.bf16.gmra.mxu0 %vm315_vm1, %v1074_v16 }
  0x29   : > { %1045 = vmatmul.mubr.msk.bf16.gmra.mxu1 %vm315_vm1, %v1075_v17 }
  0xd0   : > { %v1018_v19 = vpop.f32.mrf.mxu0 }
  0xd1   : > { %v538_v21 = vmul.f32 %v1018_v19, %v1291_v18  ;;  %v1034_v22 = vpop.f32.mrf.mxu1 }
  0xd2   : > { %v554_v23 = vmul.f32 %v1034_v22, %v1291_v18  ;;  %v402_v24 = vpop.f32.mrf.mxu0 }
  0xd3   : > { %v1301_v25 = vadd.f32 %v1296_v20, %v538_v21  ;;  %v536_v26 = vmul.f32 %v1291_v18, %v402_v24  ;;  %v466_v27 = vpop.f32.mrf.mxu1 }
  0xd4   : > { %v1305_v28 = vadd.f32 %v1296_v20, %v554_v23  ;;  %v552_v29 = vmul.f32 %v1291_v18, %v466_v27  ;;  %v1019_v30 = vpop.f32.mrf.mxu0 }
  0xd5   : > { %v965_v31 = vmul.f32 -1.442695, %v1301_v25  ;;  %v1310_v32 = vadd.f32 %v1296_v20, %v536_v26  ;;  %v539_v33 = vmul.f32 %v1019_v30, %v1291_v18  ;;  %v1035_v34 = vpop.f32.mrf.mxu1 }
  0xd6   : > { %v981_v35 = vmul.f32 -1.442695, %v1305_v28  ;;  %v1315_v36 = vadd.f32 %v1296_v20, %v552_v29  ;;  %v555_v37 = vmul.f32 %v1035_v34, %v1291_v18  ;;  %v405_v38 = vpop.f32.mrf.mxu0 }
  0xd7   : > { %1076 = vpow2.f32 %v965_v31  ;;  %v963_v39 = vmul.f32 -1.442695, %v1310_v32  ;;  %v1320_v40 = vadd.f32 %v1296_v20, %v539_v33  ;;  %v537_v41 = vmul.f32 %v1291_v18, %v405_v38  ;;  %v469_v42 = vpop.f32.mrf.mxu1 }
  0xd8   : > { %1078 = vpow2.f32 %v981_v35  ;;  %v979_v43 = vmul.f32 -1.442695, %v1315_v36  ;;  %v1325_v44 = vadd.f32 %v1296_v20, %v555_v37  ;;  %v553_v45 = vmul.f32 %v1291_v18, %v469_v42  ;;  %v1022_v46 = vpop.f32.mrf.mxu0 }
  0xd9   : > { %1080 = vpow2.f32 %v963_v39  ;;  %v966_v47 = vmul.f32 -1.442695, %v1320_v40  ;;  %v1330_v48 = vadd.f32 %v1296_v20, %v537_v41  ;;  %v542_v49 = vmul.f32 %v1022_v46, %v1291_v18  ;;  %v1038_v50 = vpop.f32.mrf.mxu1 }
  0xda   : > { %1082 = vpow2.f32 %v979_v43  ;;  %v982_v51 = vmul.f32 -1.442695, %v1325_v44  ;;  %v1335_v52 = vadd.f32 %v1296_v20, %v553_v45  ;;  %v558_v53 = vmul.f32 %v1038_v50, %v1291_v18  ;;  %v418_v54 = vpop.f32.mrf.mxu0 }
  0xdb   : > { %1084 = vpow2.f32 %v966_v47  ;;  %v964_v55 = vmul.f32 -1.442695, %v1330_v48  ;;  %v1340_v56 = vadd.f32 %v1296_v20, %v542_v49  ;;  %v540_v57 = vmul.f32 %v1291_v18, %v418_v54  ;;  %v482_v58 = vpop.f32.mrf.mxu1 }
  0xdc   : > { %1086 = vpow2.f32 %v982_v51  ;;  %v980_v59 = vmul.f32 -1.442695, %v1335_v52  ;;  %v1345_v60 = vadd.f32 %v1296_v20, %v558_v53  ;;  %v556_v61 = vmul.f32 %v1291_v18, %v482_v58  ;;  %v1023_v62 = vpop.f32.mrf.mxu0 }
  0xdd   : > { %1088 = vpow2.f32 %v964_v55  ;;  %v969_v63 = vmul.f32 -1.442695, %v1340_v56  ;;  %v1350_v0 = vadd.f32 %v1296_v20, %v540_v57  ;;  %v543_v1 = vmul.f32 %v1023_v62, %v1291_v18  ;;  %v1039_v2 = vpop.f32.mrf.mxu1 }
  0xde   : > { %1090 = vpow2.f32 %v980_v59  ;;  %v985_v3 = vmul.f32 -1.442695, %v1345_v60  ;;  %v1355_v4 = vadd.f32 %v1296_v20, %v556_v61  ;;  %v559_v5 = vmul.f32 %v1039_v2, %v1291_v18  ;;  %v421_v6 = vpop.f32.mrf.mxu0 }
  0xdf   : > { %1092 = vpow2.f32 %v969_v63  ;;  %v967_v7 = vmul.f32 -1.442695, %v1350_v0  ;;  %v1360_v8 = vadd.f32 %v1296_v20, %v543_v1  ;;  %v541_v9 = vmul.f32 %v1291_v18, %v421_v6  ;;  %v485_v10 = vpop.f32.mrf.mxu1 }
  0xe0   : > { %1094 = vpow2.f32 %v985_v3  ;;  %v983_v11 = vmul.f32 -1.442695, %v1355_v4  ;;  %v1365_v12 = vadd.f32 %v1296_v20, %v559_v5  ;;  %v557_v13 = vmul.f32 %v1291_v18, %v485_v10  ;;  %v1026_v14 = vpop.f32.mrf.mxu0 }
  0xe1   : > { %1096 = vpow2.f32 %v967_v7  ;;  %v970_v15 = vmul.f32 -1.442695, %v1360_v8  ;;  %v1370_v16 = vadd.f32 %v1296_v20, %v541_v9  ;;  %v1042_v17 = vpop.f32.mrf.mxu1  ;;  %v546_v41 = vmul.f32 %v1026_v14, %v1291_v18 }
  0xe2   : > { %1098 = vpow2.f32 %v983_v11  ;;  %v986_v19 = vmul.f32 -1.442695, %v1365_v12  ;;  %v1374_v21 = vadd.f32 %v1296_v20, %v557_v13  ;;  %v434_v22 = vpop.f32.mrf.mxu0  ;;  %v562_v46 = vmul.f32 %v1042_v17, %v1291_v18 }
  0xe3   : > { %1100 = vpow2.f32 %v970_v15  ;;  %v968_v23 = vmul.f32 -1.442695, %v1370_v16  ;;  %v498_v24 = vpop.f32.mrf.mxu1  ;;  %v544_v50 = vmul.f32 %v1291_v18, %v434_v22  ;;  %v1383_v59 = vadd.f32 %v1296_v20, %v546_v41 }
  0xe4   : > { %v1077_v26 = vpop.eup %1076  ;;  %1102 = vpow2.f32 %v986_v19  ;;  %v984_v27 = vmul.f32 -1.442695, %v1374_v21  ;;  %v1027_v29 = vpop.f32.mrf.mxu0  ;;  %v560_v54 = vmul.f32 %v1291_v18, %v498_v24  ;;  %v1387_v2 = vadd.f32 %v1296_v20, %v562_v46 }
  0xe5   : > { %v1079_v30 = vpop.eup %1078  ;;  %v705_v31 = vadd.f32 1.0, %v1077_v26  ;;  %1104 = vpow2.f32 %v968_v23  ;;  %v1043_v33 = vpop.f32.mrf.mxu1  ;;  %v547_v61 = vmul.f32 %v1027_v29, %v1291_v18  ;;  %v1391_v7 = vadd.f32 %v1296_v20, %v544_v50 }
  0xe6   : > { %v1081_v34 = vpop.eup %1080  ;;  %v721_v35 = vadd.f32 1.0, %v1079_v30  ;;  %1106 = vpow2.f32 %v984_v27  ;;  %v437_v37 = vpop.f32.mrf.mxu0  ;;  %v563_v3 = vmul.f32 %v1043_v33, %v1291_v18  ;;  %v1395_v13 = vadd.f32 %v1296_v20, %v560_v54 }
  0xe7   : > { %v1083_v38 = vpop.eup %1082  ;;  %1108 = vrcp.f32 %v705_v31  ;;  %v703_v39 = vadd.f32 1.0, %v1081_v34  ;;  %v501_v42 = vpop.f32.mrf.mxu1  ;;  %v545_v9 = vmul.f32 %v1291_v18, %v437_v37  ;;  %v973_v22 = vmul.f32 -1.442695, %v1383_v59 }
  0xe8   : > { %v1085_v43 = vpop.eup %1084  ;;  %1110 = vrcp.f32 %v721_v35  ;;  %v719_v45 = vadd.f32 1.0, %v1083_v38  ;;  %v1030_v55 = vpop.f32.mrf.mxu0  ;;  %v561_v14 = vmul.f32 %v1291_v18, %v501_v42  ;;  %v1400_v23 = vadd.f32 %v1296_v20, %v547_v61 }
  0xe9   : > { %v1087_v47 = vpop.eup %1086  ;;  %1112 = vrcp.f32 %v703_v39  ;;  %v706_v49 = vadd.f32 1.0, %v1085_v43  ;;  %v1046_v62 = vpop.f32.mrf.mxu1  ;;  %v989_v29 = vmul.f32 -1.442695, %v1387_v2  ;;  %v1404_v30 = vadd.f32 %v1296_v20, %v563_v3 }
  0xea   : > { %v1089_v51 = vpop.eup %1088  ;;  %1114 = vrcp.f32 %v719_v45  ;;  %v722_v53 = vadd.f32 1.0, %v1087_v47  ;;  %v450_v15 = vpop.f32.mrf.mxu0  ;;  %v971_v34 = vmul.f32 -1.442695, %v1391_v7  ;;  %v1409_v35 = vadd.f32 %v1296_v20, %v545_v9 }
  0xeb   : > { %v1091_v57 = vpop.eup %1090  ;;  %1116 = vrcp.f32 %v706_v49  ;;  %v704_v58 = vadd.f32 1.0, %v1089_v51  ;;  %v514_v24 = vpop.f32.mrf.mxu1  ;;  %v987_v39 = vmul.f32 -1.442695, %v1395_v13  ;;  %v1413_v41 = vadd.f32 %v1296_v20, %v561_v14 }
  0xec   : > { %v1093_v63 = vpop.eup %1092  ;;  %1118 = vrcp.f32 %v722_v53  ;;  %v720_v1 = vadd.f32 1.0, %v1091_v57  ;;  %v1031_v42 = vpop.f32.mrf.mxu0  ;;  %v974_v46 = vmul.f32 -1.442695, %v1400_v23  ;;  %v550_v47 = vmul.f32 %v1030_v55, %v1291_v18 }
  0xed   : > { %v1095_v5 = vpop.eup %1094  ;;  %1120 = vrcp.f32 %v704_v58  ;;  %v709_v6 = vadd.f32 1.0, %v1093_v63  ;;  %v1047_v49 = vpop.f32.mrf.mxu1  ;;  %v990_v53 = vmul.f32 -1.442695, %v1404_v30  ;;  %v566_v54 = vmul.f32 %v1046_v62, %v1291_v18 }
  0xee   : > { %v1097_v10 = vpop.eup %1096  ;;  %1122 = vrcp.f32 %v720_v1  ;;  %v725_v11 = vadd.f32 1.0, %v1095_v5  ;;  %v972_v55 = vmul.f32 -1.442695, %v1409_v35  ;;  %v548_v61 = vmul.f32 %v1291_v18, %v450_v15 }
  0xef   : > { %v1099_v17 = vpop.eup %1098  ;;  %1124 = vrcp.f32 %v709_v6  ;;  %v707_v19 = vadd.f32 1.0, %v1097_v10  ;;  %v988_v3 = vmul.f32 -1.442695, %v1413_v41  ;;  %v564_v5 = vmul.f32 %v1291_v18, %v514_v24  ;;  %v453_v6 = vpop.f32.mrf.mxu0 }
  0xf0   : > { %v1101_v26 = vpop.eup %1100  ;;  %1126 = vrcp.f32 %v725_v11  ;;  %v723_v27 = vadd.f32 1.0, %v1099_v17  ;;  %v1434_v9 = vadd.f32 %v1296_v20, %v550_v47  ;;  %v551_v10 = vmul.f32 %v1031_v42, %v1291_v18 }
  0xf1   : > { %v1103_v31 = vpop.eup %1102  ;;  %1128 = vrcp.f32 %v707_v19  ;;  %v710_v33 = vadd.f32 1.0, %v1101_v26  ;;  %v1441_v15 = vadd.f32 %v1296_v20, %v566_v54  ;;  %v549_v24 = vmul.f32 %v1291_v18, %v453_v6 }
  0xf2   : > { %v1105_v37 = vpop.eup %1104  ;;  %1130 = vrcp.f32 %v723_v27  ;;  %v726_v38 = vadd.f32 1.0, %v1103_v31  ;;  %v1455_v27 = vadd.f32 %v1296_v20, %v564_v5 }
  0xf3   : > { %v1107_v43 = vpop.eup %1106  ;;  %1132 = vrcp.f32 %v710_v33  ;;  %v708_v45 = vadd.f32 1.0, %v1105_v37  ;;  %v977_v33 = vmul.f32 -1.442695, %v1434_v9 }
  0xf4   : > { %v1109_v50 = vpop.eup %1108  ;;  %1134 = vrcp.f32 %v726_v38  ;;  %v724_v51 = vadd.f32 1.0, %v1107_v43  ;;  %v1477_v43 = vadd.f32 %v1296_v20, %v549_v24 }
  0xf5   : > { %v1111_v57 = vpop.eup %1110  ;;  %v801_v58 = vmul.f32 %v1109_v50, %v1301_v25  ;;  %1136 = vrcp.f32 %v708_v45 }
  0xf6   : > { %v1113_v63 = vpop.eup %1112  ;;  %v817_v1 = vmul.f32 %v1111_v57, %v1305_v28  ;;  %1138 = vrcp.f32 %v724_v51  ;;  %v517_v28 = vpop.f32.mrf.mxu1 }
  0xf7   : > { %v1115_v62 = vpop.eup %1114  ;;  %834 = vst.msk [vmem:[%s1420_s5 + $0x10] sm:$0xff] %vm831_vm2, %v801_v58  ;;  %v799_v25 = vmul.f32 %v1113_v63, %v1310_v32  ;;  %1140 = vpow2.f32 %v973_v22  ;;  %v567_v32 = vmul.f32 %v1047_v49, %v1291_v18  ;;  %v1448_v22 = vadd.f32 %v1296_v20, %v548_v61 }
  0xf8   : > { %v1117_v11 = vpop.eup %1116  ;;  %850 = vst.msk [vmem:[%s1420_s5 + $0x90] sm:$0xff] %vm831_vm2, %v817_v1  ;;  %v815_v14 = vmul.f32 %v1115_v62, %v1315_v36  ;;  %1142 = vpow2.f32 %v989_v29  ;;  %v565_v29 = vmul.f32 %v1291_v18, %v517_v28  ;;  %v993_v18 = vmul.f32 -1.442695, %v1441_v15 }
  0xf9   : > { %v1119_v17 = vpop.eup %1118  ;;  %832 = vst.msk [vmem:[%s1420_s5] sm:$0xff] %vm831_vm2, %v799_v25  ;;  %v802_v19 = vmul.f32 %v1117_v11, %v1320_v40  ;;  %1144 = vpow2.f32 %v971_v34  ;;  %v1463_v34 = vadd.f32 %v1296_v20, %v551_v10  ;;  %v1470_v38 = vadd.f32 %v1296_v20, %v567_v32 }
  0xfa   : > { %v1121_v36 = vpop.eup %1120  ;;  %848 = vst.msk [vmem:[%s1420_s5 + $0x80] sm:$0xff] %vm831_vm2, %v815_v14  ;;  %v818_v26 = vmul.f32 %v1119_v17, %v1325_v44  ;;  %1146 = vpow2.f32 %v987_v39  ;;  %v975_v42 = vmul.f32 -1.442695, %v1448_v22  ;;  %v1484_v47 = vadd.f32 %v1296_v20, %v565_v29 }
  0xfb   : > { %v1123_v40 = vpop.eup %1122  ;;  %835 = vst.msk [vmem:[%s1420_s5 + $0x18] sm:$0xff] %vm831_vm2, %v802_v19  ;;  %v800_v31 = vmul.f32 %v1121_v36, %v1330_v48  ;;  %1148 = vpow2.f32 %v974_v46  ;;  %v991_v46 = vmul.f32 -1.442695, %v1455_v27  ;;  %v978_v50 = vmul.f32 -1.442695, %v1463_v34 }
  0xfc   : > { %v1125_v44 = vpop.eup %1124  ;;  %851 = vst.msk [vmem:[%s1420_s5 + $0x98] sm:$0xff] %vm831_vm2, %v818_v26  ;;  %v816_v37 = vmul.f32 %v1123_v40, %v1335_v52  ;;  %1150 = vpow2.f32 %v990_v53  ;;  %v994_v53 = vmul.f32 -1.442695, %v1470_v38 }
  0xfd   : > { %v1127_v48 = vpop.eup %1126  ;;  %833 = vst.msk [vmem:[%s1420_s5 + $0x8] sm:$0xff] %vm831_vm2, %v800_v31  ;;  %v805_v39 = vmul.f32 %v1125_v44, %v1340_v56  ;;  %1152 = vpow2.f32 %v972_v55 }
  0xfe   : > { %v1129_v52 = vpop.eup %1128  ;;  %849 = vst.msk [vmem:[%s1420_s5 + $0x88] sm:$0xff] %vm831_vm2, %v816_v37  ;;  %v821_v45 = vmul.f32 %v1127_v48, %v1345_v60  ;;  %1154 = vpow2.f32 %v988_v3 }
  0xff   : > { %v1131_v56 = vpop.eup %1130  ;;  %838 = vst.msk [vmem:[%s1420_s5 + $0x30] sm:$0xff] %vm831_vm2, %v805_v39  ;;  %v803_v49 = vmul.f32 %v1129_v52, %v1350_v0  ;;  %1156 = vpow2.f32 %v977_v33  ;;  %v976_v0 = vmul.f32 -1.442695, %v1477_v43 }
 0x100   : > { %v1133_v51 = vpop.eup %1132  ;;  %854 = vst.msk [vmem:[%s1420_s5 + $0xb0] sm:$0xff] %vm831_vm2, %v821_v45  ;;  %v819_v60 = vmul.f32 %v1131_v56, %v1355_v4  ;;  %1158 = vpow2.f32 %v993_v18  ;;  %v992_v4 = vmul.f32 -1.442695, %v1484_v47 }
 0x101   : > { %v1135_v20 = vpop.eup %1134  ;;  %836 = vst.msk [vmem:[%s1420_s5 + $0x20] sm:$0xff] %vm831_vm2, %v803_v49  ;;  %v806_v54 = vmul.f32 %v1133_v51, %v1360_v8  ;;  %1160 = vpow2.f32 %v975_v42 }
 0x102   : > { %v1137_v57 = vpop.eup %1136  ;;  %852 = vst.msk [vmem:[%s1420_s5 + $0xa0] sm:$0xff] %vm831_vm2, %v819_v60  ;;  %v822_v58 = vmul.f32 %v1135_v20, %v1365_v12  ;;  %1162 = vpow2.f32 %v991_v46 }
 0x103   : > { %v1139_v55 = vpop.eup %1138  ;;  %839 = vst.msk [vmem:[%s1420_s5 + $0x38] sm:$0xff] %vm831_vm2, %v806_v54  ;;  %v804_v61 = vmul.f32 %v1137_v57, %v1370_v16  ;;  %1164 = vpow2.f32 %v978_v50 }
 0x104   : > { %v1141_v8 = vpop.eup %1140  ;;  %855 = vst.msk [vmem:[%s1420_s5 + $0xb8] sm:$0xff] %vm831_vm2, %v822_v58  ;;  %v820_v63 = vmul.f32 %v1139_v55, %v1374_v21  ;;  %1166 = vpow2.f32 %v994_v53 }
 0x105   : > { %v1143_v1 = vpop.eup %1142  ;;  %837 = vst.msk [vmem:[%s1420_s5 + $0x28] sm:$0xff] %vm831_vm2, %v804_v61  ;;  %v713_v12 = vadd.f32 1.0, %v1141_v8  ;;  %1168 = vpow2.f32 %v976_v0 }
 0x106   : > { %v1145_v3 = vpop.eup %1144  ;;  %853 = vst.msk [vmem:[%s1420_s5 + $0xa8] sm:$0xff] %vm831_vm2, %v820_v63  ;;  %v729_v5 = vadd.f32 1.0, %v1143_v1  ;;  %1170 = vpow2.f32 %v992_v4 }
 0x107   : > { %v1147_v6 = vpop.eup %1146  ;;  %1172 = vrcp.f32 %v713_v12  ;;  %v711_v16 = vadd.f32 1.0, %v1145_v3 }
 0x108   : > { %v1149_v62 = vpop.eup %1148  ;;  %1174 = vrcp.f32 %v729_v5  ;;  %v727_v25 = vadd.f32 1.0, %v1147_v6 }
 0x109   : > { %v1151_v10 = vpop.eup %1150  ;;  %1176 = vrcp.f32 %v711_v16  ;;  %v714_v21 = vadd.f32 1.0, %v1149_v62 }
 0x10a   : > { %v1153_v28 = vpop.eup %1152  ;;  %1178 = vrcp.f32 %v727_v25  ;;  %v730_v11 = vadd.f32 1.0, %v1151_v10 }
 0x10b   : > { %v1155_v14 = vpop.eup %1154  ;;  %1180 = vrcp.f32 %v714_v21  ;;  %v712_v32 = vadd.f32 1.0, %v1153_v28 }
 0x10c   : > { %v1157_v17 = vpop.eup %1156  ;;  %1182 = vrcp.f32 %v730_v11  ;;  %v728_v19 = vadd.f32 1.0, %v1155_v14 }
 0x10d   : > { %v1159_v24 = vpop.eup %1158  ;;  %1184 = vrcp.f32 %v712_v32  ;;  %v717_v36 = vadd.f32 1.0, %v1157_v17 }
 0x10e   : > { %v1161_v26 = vpop.eup %1160  ;;  %1186 = vrcp.f32 %v728_v19  ;;  %v733_v29 = vadd.f32 1.0, %v1159_v24 }
 0x10f   : > { %v1163_v40 = vpop.eup %1162  ;;  %1188 = vrcp.f32 %v717_v36  ;;  %v715_v31 = vadd.f32 1.0, %v1161_v26 }
 0x110   : > { %v1165_v33 = vpop.eup %1164  ;;  %1190 = vrcp.f32 %v733_v29  ;;  %v731_v44 = vadd.f32 1.0, %v1163_v40 }
 0x111   : > { %v1167_v37 = vpop.eup %1166  ;;  %1192 = vrcp.f32 %v715_v31  ;;  %v718_v18 = vadd.f32 1.0, %v1165_v33 }
 0x112   : > { %v1169_v48 = vpop.eup %1168  ;;  %1194 = vrcp.f32 %v731_v44  ;;  %v734_v39 = vadd.f32 1.0, %v1167_v37 }
 0x113   : > { %v1171_v42 = vpop.eup %1170  ;;  %1196 = vrcp.f32 %v718_v18  ;;  %v716_v52 = vadd.f32 1.0, %v1169_v48 }
 0x114   : > { %v1173_v45 = vpop.eup %1172  ;;  %1198 = vrcp.f32 %v734_v39  ;;  %v732_v46 = vadd.f32 1.0, %v1171_v42 }
 0x115   : > { %v1175_v56 = vpop.eup %1174  ;;  %v809_v49 = vmul.f32 %v1173_v45, %v1383_v59  ;;  %1200 = vrcp.f32 %v716_v52 }
 0x116   : > { %v1177_v50 = vpop.eup %1176  ;;  %v825_v51 = vmul.f32 %v1175_v56, %v1387_v2  ;;  %1202 = vrcp.f32 %v732_v46 }
 0x117   : > { %v1179_v60 = vpop.eup %1178  ;;  %842 = vst.msk [vmem:[%s1420_s5 + $0x50] sm:$0xff] %vm831_vm2, %v809_v49  ;;  %v807_v53 = vmul.f32 %v1177_v50, %v1391_v7 }
 0x118   : > { %v1181_v20 = vpop.eup %1180  ;;  %858 = vst.msk [vmem:[%s1420_s5 + $0xd0] sm:$0xff] %vm831_vm2, %v825_v51  ;;  %v823_v54 = vmul.f32 %v1179_v60, %v1395_v13 }
 0x119   : > { %v1183_v0 = vpop.eup %1182  ;;  %840 = vst.msk [vmem:[%s1420_s5 + $0x40] sm:$0xff] %vm831_vm2, %v807_v53  ;;  %v810_v59 = vmul.f32 %v1181_v20, %v1400_v23 }
 0x11a   : > { %v1185_v2 = vpop.eup %1184  ;;  %856 = vst.msk [vmem:[%s1420_s5 + $0xc0] sm:$0xff] %vm831_vm2, %v823_v54  ;;  %v826_v57 = vmul.f32 %v1183_v0, %v1404_v30 }
 0x11b   : > { %v1187_v58 = vpop.eup %1186  ;;  %843 = vst.msk [vmem:[%s1420_s5 + $0x58] sm:$0xff] %vm831_vm2, %v810_v59  ;;  %v808_v7 = vmul.f32 %v1185_v2, %v1409_v35 }
 0x11c   : > { %v1189_v4 = vpop.eup %1188  ;;  %859 = vst.msk [vmem:[%s1420_s5 + $0xd8] sm:$0xff] %vm831_vm2, %v826_v57  ;;  %v824_v13 = vmul.f32 %v1187_v58, %v1413_v41 }
 0x11d   : > { %v1191_v55 = vpop.eup %1190  ;;  %841 = vst.msk [vmem:[%s1420_s5 + $0x48] sm:$0xff] %vm831_vm2, %v808_v7  ;;  %v813_v23 = vmul.f32 %v1189_v4, %v1434_v9 }
 0x11e   : > { %v1193_v61 = vpop.eup %1192  ;;  %857 = vst.msk [vmem:[%s1420_s5 + $0xc8] sm:$0xff] %vm831_vm2, %v824_v13  ;;  %v829_v30 = vmul.f32 %v1191_v55, %v1441_v15 }
 0x11f   : > { %v1195_v35 = vpop.eup %1194  ;;  %846 = vst.msk [vmem:[%s1420_s5 + $0x70] sm:$0xff] %vm831_vm2, %v813_v23  ;;  %v811_v8 = vmul.f32 %v1193_v61, %v1448_v22 }
 0x120   : > { %v1197_v41 = vpop.eup %1196  ;;  %862 = vst.msk [vmem:[%s1420_s5 + $0xf0] sm:$0xff] %vm831_vm2, %v829_v30  ;;  %v827_v63 = vmul.f32 %v1195_v35, %v1455_v27 }
 0x121   : > { %v1199_v9 = vpop.eup %1198  ;;  %844 = vst.msk [vmem:[%s1420_s5 + $0x60] sm:$0xff] %vm831_vm2, %v811_v8  ;;  %v814_v1 = vmul.f32 %v1197_v41, %v1463_v34 }
 0x122   : > { %v1201_v12 = vpop.eup %1200  ;;  %860 = vst.msk [vmem:[%s1420_s5 + $0xe0] sm:$0xff] %vm831_vm2, %v827_v63  ;;  %v830_v15 = vmul.f32 %v1199_v9, %v1470_v38 }
 0x123   : > { %v1203_v3 = vpop.eup %1202  ;;  %847 = vst.msk [vmem:[%s1420_s5 + $0x78] sm:$0xff] %vm831_vm2, %v814_v1  ;;  %v812_v22 = vmul.f32 %v1201_v12, %v1477_v43 }
 0x124   : > { %863 = vst.msk [vmem:[%s1420_s5 + $0xf8] sm:$0xff] %vm831_vm2, %v830_v15  ;;  %v828_v5 = vmul.f32 %v1203_v3, %v1484_v47 }
 0x125   : > { %845 = vst.msk [vmem:[%s1420_s5 + $0x68] sm:$0xff] %vm831_vm2, %v812_v22 }
 0x126   : > { %861 = vst.msk [vmem:[%s1420_s5 + $0xe8] sm:$0xff] %vm831_vm2, %v828_v5 }
 0x127 PF: > { %s14_s15 = sadd.s32 1, %s1210_s15  }
 0x128   : > { %p11_p4 = scmp.ge.s32.totalorder %s14_s15, 4  }
 0x12a   :  { %13 = sbr.rel (!%p11_p4) target bundleno = 1 (0x1), region = 66 }

</bundles_post_ra>
